<compile_context>
chip_gen: v7x
topology: tpu7x:2x2x1
jax: 0.10.0
libtpu: 0.0.40
codegen_flags: <defaults>
</compile_context>

<pallas_src>
import functools

import jax
import jax.numpy as jnp
from jax.experimental import pallas as pl
from jax.experimental.pallas import tpu as pltpu

LANES = 128
MAX_BLOCK_ROWS = 2048   # 1 MiB f32 input tile per grid step (2 MiB double-buffered)
NUM_SPLITS = 2          # leading "parallel" grid axis (v7x: 2 TensorCores)


def _sse_kernel(target_ref, x_ref, o_ref, acc_ref, *,
                n_valid, blocks_per_split, inv_n):
    """Per-split accumulation of sum((target - x)^2), scaled by 1/n at the end."""
    p = pl.program_id(0)          # core-split index ("parallel")
    i = pl.program_id(1)          # reduction step   ("arbitrary")

    @pl.when(i == 0)
    def _():
        acc_ref[...] = jnp.zeros_like(acc_ref)

    rows, lanes = x_ref.shape
    # Global element index covered by this logical (unclamped) block; elements
    # past n_valid (padding, cdiv overhang, clamped duplicate blocks) are masked.
    blk = p * blocks_per_split + i
    base = blk * (rows * lanes)
    row_ids = jax.lax.broadcasted_iota(jnp.int32, (rows, lanes), 0)
    lane_ids = jax.lax.broadcasted_iota(jnp.int32, (rows, lanes), 1)
    idx = base + row_ids * lanes + lane_ids

    x = x_ref[...].astype(jnp.float32)
    d = jnp.where(idx < n_valid, target_ref[0] - x, jnp.float32(0.0))
    acc_ref[...] += d * d         # pure VPU work; hides under the input DMA

    @pl.when(i == pl.num_programs(1) - 1)
    def _():
        partial = jnp.sum(acc_ref[...]) * inv_n   # one reduce + scale per split
        o_ref[...] = jnp.full(o_ref.shape, partial, dtype=jnp.float32)


@jax.jit
def _mean_sq_err_to_target(x, target):
    """mean((target - x)^2) via a Pallas TPU reduction kernel."""
    n = x.size
    flat = jnp.ravel(x)
    pad = (-n) % LANES
    if pad:
        # Rare path (numel not a multiple of 128): pad to a full lane row; the
        # padded elements are masked out in-kernel so the pad value is irrelevant.
        flat = jnp.pad(flat, (0, pad))
    n_rows = flat.size // LANES
    x2d = flat.reshape(n_rows, LANES)   # bitcast under jit when pad == 0

    if n_rows >= 8:
        row_block = min(MAX_BLOCK_ROWS, (n_rows // 8) * 8)
    else:
        row_block = n_rows              # tiny input: block == full array rows
    num_blocks = -(-n_rows // row_block)
    blocks_per_split = -(-num_blocks // NUM_SPLITS)

    target_smem = jnp.reshape(target, (1,)).astype(jnp.float32)

    def x_index_map(p, i):
        # Clamp so duplicated / overhanging steps still DMA an in-bounds block;
        # the in-kernel element mask zeroes their contribution.
        return (jnp.minimum(p * blocks_per_split + i, num_blocks - 1), 0)

    partials = pl.pallas_call(
        functools.partial(_sse_kernel, n_valid=n,
                          blocks_per_split=blocks_per_split, inv_n=1.0 / n),
        out_shape=jax.ShapeDtypeStruct((1, NUM_SPLITS * LANES), jnp.float32),
        grid_spec=pltpu.PrefetchScalarGridSpec(
            num_scalar_prefetch=0,
            grid=(NUM_SPLITS, blocks_per_split),
            in_specs=[
                pl.BlockSpec(memory_space=pltpu.MemorySpace.SMEM),   # target scalar
                pl.BlockSpec((row_block, LANES), x_index_map),
            ],
            out_specs=pl.BlockSpec((1, LANES), lambda p, i: (0, p)),
            scratch_shapes=[pltpu.VMEM((row_block, LANES), jnp.float32)],
        ),
        compiler_params=pltpu.CompilerParams(
            dimension_semantics=("parallel", "arbitrary")),
    )(target_smem, x2d)

    # Each split filled its (1,128) output block with its scaled partial sum.
    return partials[0, 0] + partials[0, LANES]


class LSGAN:
    """JAX/Pallas port of the PyTorch LSGAN loss module."""

    def __init__(self, target_real, target_fake):
        self.target_real = float(target_real)
        self.target_fake = float(target_fake)

    def __call__(self, inputs, is_real):
        target = jnp.float32(self.target_real if is_real else self.target_fake)
        if not isinstance(inputs, (list, tuple)):
            inputs = [inputs]
        loss = jnp.float32(0.0)
        for ipt in inputs:
            loss = loss + _mean_sq_err_to_target(ipt, target)
        return loss


if __name__ == "__main__":
    key = jax.random.PRNGKey(0)
    k1, k2 = jax.random.split(key)

    # Discriminator-style outputs, NCHW.
    x1 = jax.random.normal(k1, (2, 4, 16, 16), dtype=jnp.float32)
    x2 = jax.random.normal(k2, (2, 1, 8, 8), dtype=jnp.float32)

    loss_fn = LSGAN(target_real=1.0, target_fake=0.0)

    # Single-tensor path (is_real=True) and list path (is_real=False).
    out_single = loss_fn(x1, True)
    out_list = loss_fn([x1, x2], False)
    jax.block_until_ready(out_single)
    jax.block_until_ready(out_list)

    # Pure-JAX reference check.
    ref_single = jnp.mean((1.0 - x1) ** 2)
    ref_list = jnp.mean((0.0 - x1) ** 2) + jnp.mean((0.0 - x2) ** 2)
    assert jnp.allclose(out_single, ref_single, rtol=1e-5, atol=1e-5)
    assert jnp.allclose(out_list, ref_list, rtol=1e-5, atol=1e-5)

    print("KERNEL_OK")
</pallas_src>

<mosaic_0001>
module attributes {stable_mosaic.version = 11 : i64} {
  func.func @_sse_kernel(%arg0: i32, %arg1: i32, %arg2: memref<1xf32, #tpu.memory_space<smem>>, %arg3: memref<16x128xf32, #tpu.memory_space<vmem>>, %arg4: memref<1x128xf32, #tpu.memory_space<vmem>>, %arg5: memref<16x128xf32, #tpu.memory_space<vmem>>) attributes {dimension_semantics = [#tpu.dimension_semantics<parallel>, #tpu.dimension_semantics<arbitrary>], iteration_bounds = array<i64: 2, 1>, scalar_prefetch = 0 : i64, scratch_operands = 1 : i64, tpu.core_type = #tpu.core_type<tc>, window_params = [{transform_indices = @transform_0, window_bounds = array<i64: 1>}, {transform_indices = @transform_1, window_bounds = array<i64: 16, 128>}, {transform_indices = @transform_2, window_bounds = array<i64: 1, 128>}]} {
    %c0_i32 = arith.constant 0 : i32
    %0 = arith.cmpi eq, %arg1, %c0_i32 : i32
    %1 = arith.extui %0 : i1 to i32
    %c0_i32_0 = arith.constant 0 : i32
    %2 = arith.cmpi ne, %1, %c0_i32_0 : i32
    scf.if %2 {
      %cst_10 = arith.constant 0.000000e+00 : f32
      %28 = vector.broadcast %cst_10 : f32 to vector<16x128xf32>
      %c0_11 = arith.constant 0 : index
      %c0_12 = arith.constant 0 : index
      %29 = vector.load %arg5[%c0_11, %c0_12] : memref<16x128xf32, #tpu.memory_space<vmem>>, vector<16x128xf32>
      tpu.vector_store %arg5[%c0_11, %c0_12], %28 {strides = array<i32>} : memref<16x128xf32, #tpu.memory_space<vmem>>, vector<16x128xf32>,
    } else {
    }
    %c1_i32 = arith.constant 1 : i32
    %3 = arith.muli %arg0, %c1_i32 : i32
    %4 = arith.addi %3, %arg1 : i32
    %c2048_i32 = arith.constant 2048 : i32
    %5 = arith.muli %4, %c2048_i32 : i32
    %6 = tpu.iota {dimensions = array<i32: 0>} : vector<16x128xi32>
    %7 = tpu.iota {dimensions = array<i32: 1>} : vector<16x128xi32>
    %c128_i32 = arith.constant 128 : i32
    %8 = vector.broadcast %c128_i32 : i32 to vector<16x128xi32>
    %9 = arith.muli %6, %8 : vector<16x128xi32>
    %10 = vector.broadcast %5 : i32 to vector<16x128xi32>
    %11 = arith.addi %10, %9 : vector<16x128xi32>
    %12 = arith.addi %11, %7 : vector<16x128xi32>
    %c0 = arith.constant 0 : index
    %c0_1 = arith.constant 0 : index
    %13 = vector.load %arg3[%c0, %c0_1] : memref<16x128xf32, #tpu.memory_space<vmem>>, vector<16x128xf32>
    %c2048_i32_2 = arith.constant 2048 : i32
    %14 = vector.broadcast %c2048_i32_2 : i32 to vector<16x128xi32>
    %15 = arith.cmpi slt, %12, %14 : vector<16x128xi32>
    %c0_3 = arith.constant 0 : index
    %16 = memref.load %arg2[%c0_3] : memref<1xf32, #tpu.memory_space<smem>>
    %17 = vector.broadcast %16 : f32 to vector<16x128xf32>
    %18 = arith.subf %17, %13 : vector<16x128xf32>
    %cst = arith.constant 0.000000e+00 : f32
    %19 = vector.broadcast %cst : f32 to vector<16x128xf32>
    %20 = arith.select %15, %18, %19 : vector<16x128xi1>, vector<16x128xf32>
    %c0_4 = arith.constant 0 : index
    %c0_5 = arith.constant 0 : index
    %21 = vector.load %arg5[%c0_4, %c0_5] : memref<16x128xf32, #tpu.memory_space<vmem>>, vector<16x128xf32>
    %22 = arith.mulf %20, %20 : vector<16x128xf32>
    %23 = arith.addf %21, %22 : vector<16x128xf32>
    %c0_6 = arith.constant 0 : index
    %c0_7 = arith.constant 0 : index
    %24 = vector.load %arg5[%c0_6, %c0_7] : memref<16x128xf32, #tpu.memory_space<vmem>>, vector<16x128xf32>
    tpu.vector_store %arg5[%c0_6, %c0_7], %23 {strides = array<i32>} : memref<16x128xf32, #tpu.memory_space<vmem>>, vector<16x128xf32>,
    %c0_i32_8 = arith.constant 0 : i32
    %25 = arith.cmpi eq, %arg1, %c0_i32_8 : i32
    %26 = arith.extui %25 : i1 to i32
    %c0_i32_9 = arith.constant 0 : i32
    %27 = arith.cmpi ne, %26, %c0_i32_9 : i32
    scf.if %27 {
      %c0_10 = arith.constant 0 : index
      %c0_11 = arith.constant 0 : index
      %28 = vector.load %arg5[%c0_10, %c0_11] : memref<16x128xf32, #tpu.memory_space<vmem>>, vector<16x128xf32>
      %29 = vector.shape_cast %28 : vector<16x128xf32> to vector<1x16x128xf32>
      %cst_12 = arith.constant dense<0.000000e+00> : vector<1xf32>
      %30 = vector.multi_reduction <add>, %29, %cst_12 [1, 2] : vector<1x16x128xf32> to vector<1xf32>
      %31 = vector.shape_cast %30 : vector<1xf32> to vector<1x1x1xf32>
      %32 = vector.extract %31[0, 0, 0] : f32 from vector<1x1x1xf32>
      %cst_13 = arith.constant 4.8828125E-4 : f32
      %33 = arith.mulf %32, %cst_13 : f32
      %34 = vector.broadcast %33 : f32 to vector<1x128xf32>
      %c0_14 = arith.constant 0 : index
      %c0_15 = arith.constant 0 : index
      %35 = vector.load %arg4[%c0_14, %c0_15] : memref<1x128xf32, #tpu.memory_space<vmem>>, vector<1x128xf32>
      tpu.vector_store %arg4[%c0_14, %c0_15], %34 {strides = array<i32>} : memref<1x128xf32, #tpu.memory_space<vmem>>, vector<1x128xf32>,
    } else {
    }
    return
  }
  func.func @transform_0(%arg0: i32, %arg1: i32) -> i32 {
    %c0_i32 = arith.constant 0 : i32
    %c0_i32_0 = arith.constant 0 : i32
    return %c0_i32 : i32
  }
  func.func @transform_1(%arg0: i32, %arg1: i32) -> (i32, i32) {
    %c1_i32 = arith.constant 1 : i32
    %0 = arith.muli %arg0, %c1_i32 : i32
    %1 = arith.addi %0, %arg1 : i32
    %c0_i32 = arith.constant 0 : i32
    %2 = arith.minsi %1, %c0_i32 : i32
    %c0_i32_0 = arith.constant 0 : i32
    %c0_i32_1 = arith.constant 0 : i32
    return %2, %c0_i32_0 : i32, i32
  }
  func.func @transform_2(%arg0: i32, %arg1: i32) -> (i32, i32) {
    %c0_i32 = arith.constant 0 : i32
    %c0_i32_0 = arith.constant 0 : i32
    return %c0_i32, %arg0 : i32, i32
  }
}

</mosaic_0001>

<bundles_post_ra>
// kernel: _mean_sq_err_to_target.1
= control target key start
LH: loop header
LB: loop body
LE: loop exit
PB: predicated region body
PF: predicated region fallthrough
CT: control target
= control target key end

     0   :  { %s365_s11 = smov 0   ;;  %s367_s12 = smov 0   ;;  %s405_s0 = inlined_call_operand.<no memory space> [shape: f32[1], index: 0, kind: input, shape index: {}]   ;;  %s406_s1 = inlined_call_operand.vmem [shape: f32[16,128], index: 1, kind: input, shape index: {}]   ;;  %s407_s2 = inlined_call_operand.vmem [shape: f32[1,256], index: 2, kind: output, shape index: {}]  }
   0x1   :  { %7 = sst [smem:[#allocation3]] %s405_s0  ;;  %s369_s13 = smov 0  }
   0x2 LB: > { %s25_s0 = sadd.s32 1, %s341_s12  ;;  %p291_p0 = scmp.ge.s32.totalorder %s345_s13, 1  ;;  %s345_s13 = sphi %s369_s13, %s13_s13   ;;  %s341_s12 = sphi %s367_s12, %s409_s12   ;;  %s337_s11 = sphi %s365_s11, %s408_s11  }
   0x3   : > { %p27_p1 = scmp.ge.s32.totalorder %s25_s0, 2  ;;  %p138_p2 = scmp.lt.s32.totalorder %s345_s13, 3 }
   0x5   : > { %s411_s0 = smov (%p27_p1, %s25_s0), 0  ;;  %p139_p3 = pnand %p291_p0, %p138_p2 }
   0x6   : > { %p162_p4 = scmp.lt.s32.totalorder (!%p139_p3), %s337_s11, 0  ;;  %s294_s14 = sshll.u32 (!%p139_p3), %s337_s11, 11  ;;  %v184_v0 = vlaneseq (!%p139_p3) }
   0x7   : > { %142 = sbr.rel (%p139_p3) target bundleno = 238 (0xee), region = 28  ;;  %s200_s15 = sld [smem:[#allocation3]] (!%p139_p3)  ;;  %v191_v2 = vstv (!%p139_p3), %s294_s14 }
   0x8   : > { %v185_v1 = vshrl.u32 (!%p139_p3), %v184_v0, 7  ;;  %v188_v4 = vand.u32 (!%p139_p3), 127, %v184_v0  ;;  %p173_p6 = scmp.lt.s32.totalorder (!%p139_p3), %s337_s11, 1 }
   0xa   : > { %v186_v3 = vadd.s32 (!%p139_p3), 8, %v185_v1  ;;  %v189_v5 = vmul.u32 (!%p139_p3), 128, %v185_v1 }
   0xc   : > { %v190_v6 = vmul.u32 (!%p139_p3), 128, %v186_v3  ;;  %v192_v7 = vadd.s32 (!%p139_p3), %v191_v2, %v189_v5 }
   0xd   : > { %v201_v10 = vstv (!%p139_p3), %s200_s15 }
   0xe   : > { %s163_s16 = scalar_select %p162_p4, %s337_s11, 0  ;;  %v193_v8 = vadd.s32 %v191_v2, %v190_v6  ;;  %v194_v9 = vadd.s32 %v192_v7, %v188_v4 }
   0xf   : > { %s415_s11 = smov (!%p173_p6, %s337_s11), 1 }
  0x10   : > { %s292_s17 = sshll.u32 %s163_s16, 1  ;;  %v195_v11 = vadd.s32 %v193_v8, %v188_v4  ;;  %vm198_vm0 = vcmp.lt.s32.totalorder %v194_v9, 2048  ;;  %s175_s25 = scalar_lea.vmem %s407_s2, %s415_s11 }
  0x11   : > { %p165_p5 = scmp.lt.s32.totalorder %s292_s17, 1 }
  0x12   : > { %vm199_vm1 = vcmp.lt.s32.totalorder %v195_v11, 2048 }
  0x13   : > { %s413_s17 = smov (!%p165_p5, %s292_s17), 1 }
  0x14   : > { %s293_s18 = sshll.u32 %s413_s17, 3 }
  0x15   : > { %s168_s21 = scalar_lea.vmem %s406_s1, %s293_s18 }
  0x16   : > { %v196_v12 = vld [vmem:[%s168_s21] sm:$0xff]  ;;  %v197_v13 = vld [vmem:[%s168_s21 + $0x8] sm:$0xff] }
  0x17   : > { %v202_v14 = vsub.f32 %v201_v10, %v196_v12  ;;  %v203_v15 = vsub.f32 %v201_v10, %v197_v13 }
  0x19   : > { %v204_v16 = vsel %vm198_vm0, %v202_v14, 0.0  ;;  %v205_v17 = vsel %vm199_vm1, %v203_v15, 0.0 }
  0x1a   : > { %v208_v18 = vmul.f32 %v204_v16, %v204_v16  ;;  %v209_v19 = vmul.f32 %v205_v17, %v205_v17 }
  0x1c   : > { %v219_v20 = vadd.f32 %v209_v19, %v208_v18 }
  0x1e   : > { %220 = vadd.xlane.f32.xlu0 %v219_v20 }
  0xab   : > { %v221_v21 = vpop.xlane.xlu0 %220 }
  0xac   : > { %v222_v22 = vrot.slane %v221_v21, 4 }
  0xae   : > { %v223_v23 = vadd.f32 %v222_v22, %v221_v21 }
  0xb0   : > { %v224_v24 = vrot.slane %v223_v23, 2 }
  0xb2   : > { %v225_v25 = vadd.f32 %v224_v24, %v223_v23 }
  0xb4   : > { %v226_v26 = vrot.slane %v225_v25, 1 }
  0xb6   : > { %v227_v27 = vadd.f32 %v226_v26, %v225_v25 }
  0xb8   : > { %297 = vpush %v227_v27 }
  0xe9   : > { %s298_s22 = spop %297 }
  0xea   : > { %s229_s26 = smul.f32 0.00048828125, %s298_s22 }
  0xec   : > { %v230_v28 = vstv %s229_s26 }
  0xed   : > { %231 = vst [vmem:[%s175_s25] sm:$0x1] %v230_v28 }
  0xee PF: > { %s13_s13 = sadd.s32 1, %s345_s13   ;;  %s408_s11 = smov %s341_s12 }
  0xef   : > { %p10_p7 = scmp.ge.s32.totalorder %s13_s13, 4   ;;  %s409_s12 = smov %s411_s0 }
  0xf1   :  { %12 = sbr.rel (!%p10_p7) target bundleno = 2 (0x2), region = 66 }

</bundles_post_ra>
